<compile_context>
chip_gen: v7x
topology: tpu7x:2x2x1
jax: 0.10.0
libtpu: 0.0.40
codegen_flags: <defaults>
</compile_context>

<pallas_src>
import functools

import jax
import jax.numpy as jnp
from jax import lax
from jax.experimental import pallas as pl
from jax.experimental.pallas import tpu as pltpu

# ---------------------------------------------------------------------------
# DenseNet-121 architecture constants
# ---------------------------------------------------------------------------
GROWTH = 32
BN_SIZE = 4
BLOCK_CONFIG = (6, 12, 24, 16)
NUM_INIT_FEATURES = 64
BN_EPS = 1e-5


def _round_up(x, m):
    return (x + m - 1) // m * m


# Generation-aware GEMM tile limits: v5e MXU is 128-wide, v6e/v7x are 256-wide.
try:
    _DEVICE_KIND = jax.devices()[0].device_kind.lower()
except Exception:  # pragma: no cover
    _DEVICE_KIND = ""
_IS_V5 = "v5" in _DEVICE_KIND
_MAX_MN_TILE = 128 if _IS_V5 else 256


def _pick_m(m):
    t = _MAX_MN_TILE
    if m % t == 0:
        return m, t
    if m >= t:
        return _round_up(m, t), t
    mp = _round_up(m, 16)
    return mp, mp


def _pick_n(np_):
    return 256 if (not _IS_V5 and np_ % 256 == 0) else 128


def _pick_k(kp):
    for t in (512, 384, 256, 128):
        if kp % t == 0:
            return t
    return 128


# ---------------------------------------------------------------------------
# Pallas kernels
# ---------------------------------------------------------------------------
def _matmul_kernel(a_ref, b_ref, o_ref, acc_ref):
    @pl.when(pl.program_id(2) == 0)
    def _():
        acc_ref[...] = jnp.zeros_like(acc_ref)

    acc_ref[...] += jnp.dot(a_ref[...], b_ref[...],
                            preferred_element_type=jnp.float32)

    @pl.when(pl.program_id(2) == pl.num_programs(2) - 1)
    def _():
        o_ref[...] = acc_ref[...].astype(o_ref.dtype)


def _bn_relu_matmul_kernel(a_ref, s_ref, t_ref, b_ref, o_ref, acc_ref):
    # BN affine (precomputed per-channel scale/shift from batch stats) + ReLU applied
    # to the A tile as a VPU prologue, then bf16 MXU matmul with f32 accumulation.
    @pl.when(pl.program_id(2) == 0)
    def _():
        acc_ref[...] = jnp.zeros_like(acc_ref)

    a = a_ref[...].astype(jnp.float32) * s_ref[...] + t_ref[...]
    a = jnp.maximum(a, 0.0).astype(jnp.bfloat16)
    acc_ref[...] += jnp.dot(a, b_ref[...], preferred_element_type=jnp.float32)

    @pl.when(pl.program_id(2) == pl.num_programs(2) - 1)
    def _():
        o_ref[...] = acc_ref[...].astype(o_ref.dtype)


def _bn_stats_kernel(x_ref, s_ref, ss_ref):
    x = x_ref[...].astype(jnp.float32)
    s_ref[...] = jnp.sum(x, axis=0, keepdims=True)
    ss_ref[...] = jnp.sum(x * x, axis=0, keepdims=True)


def _bn_relu_kernel(x_ref, g_ref, b_ref, o_ref):
    # Train-mode BN (batch stats over all rows of the block) fused with ReLU.
    x = x_ref[...].astype(jnp.float32)
    n = jnp.float32(x.shape[0])
    s = jnp.sum(x, axis=0, keepdims=True)
    ss = jnp.sum(x * x, axis=0, keepdims=True)
    mean = s / n
    var = jnp.maximum(ss / n - mean * mean, 0.0)   # clamp single-pass variance
    inv = lax.rsqrt(var + BN_EPS)
    y = (x - mean) * (inv * g_ref[...]) + b_ref[...]
    o_ref[...] = jnp.maximum(y, 0.0).astype(o_ref.dtype)


def _window_max_kernel(x_ref, o_ref):
    o_ref[...] = jnp.max(x_ref[...], axis=0)


def _window_mean_kernel(x_ref, o_ref):
    o_ref[...] = jnp.mean(x_ref[...].astype(jnp.float32), axis=0).astype(o_ref.dtype)


# ---------------------------------------------------------------------------
# Shape-specialized GEMM launchers (constructed per real shape, traced under jit)
# ---------------------------------------------------------------------------
def _matmul(a, w, out_dtype=jnp.bfloat16):
    """a: (M, Kp) bf16, w: (Kp, Np) bf16 -> (M, Np)."""
    m, kp = a.shape
    _, np_ = w.shape
    mp, tm = _pick_m(m)
    tn = _pick_n(np_)
    tk = _pick_k(kp)
    if mp > m:
        a = jnp.pad(a, ((0, mp - m), (0, 0)))
    out = pl.pallas_call(
        _matmul_kernel,
        out_shape=jax.ShapeDtypeStruct((mp, np_), out_dtype),
        grid_spec=pltpu.PrefetchScalarGridSpec(
            num_scalar_prefetch=0,
            grid=(mp // tm, np_ // tn, kp // tk),
            in_specs=[pl.BlockSpec((tm, tk), lambda i, j, k: (i, k)),
                      pl.BlockSpec((tk, tn), lambda i, j, k: (k, j))],
            out_specs=pl.BlockSpec((tm, tn), lambda i, j, k: (i, j)),
            scratch_shapes=[pltpu.VMEM((tm, tn), jnp.float32)]),
        compiler_params=pltpu.CompilerParams(
            dimension_semantics=("parallel", "parallel", "arbitrary")),
    )(a, w)
    return out[:m]


def _bn_relu_matmul(a, scale, shift, w, out_dtype=jnp.bfloat16):
    """Fused (a*scale+shift -> ReLU) @ w.  a: (M, Kp) bf16; scale/shift: (1, Kp) f32."""
    m, kp = a.shape
    _, np_ = w.shape
    mp, tm = _pick_m(m)
    tn = _pick_n(np_)
    tk = _pick_k(kp)
    if mp > m:
        a = jnp.pad(a, ((0, mp - m), (0, 0)))
    out = pl.pallas_call(
        _bn_relu_matmul_kernel,
        out_shape=jax.ShapeDtypeStruct((mp, np_), out_dtype),
        grid_spec=pltpu.PrefetchScalarGridSpec(
            num_scalar_prefetch=0,
            grid=(mp // tm, np_ // tn, kp // tk),
            in_specs=[pl.BlockSpec((tm, tk), lambda i, j, k: (i, k)),
                      pl.BlockSpec((1, tk), lambda i, j, k: (0, k)),
                      pl.BlockSpec((1, tk), lambda i, j, k: (0, k)),
                      pl.BlockSpec((tk, tn), lambda i, j, k: (k, j))],
            out_specs=pl.BlockSpec((tm, tn), lambda i, j, k: (i, j)),
            scratch_shapes=[pltpu.VMEM((tm, tn), jnp.float32)]),
        compiler_params=pltpu.CompilerParams(
            dimension_semantics=("parallel", "parallel", "arbitrary")),
    )(a, scale, shift, w)
    return out[:m]


# ---------------------------------------------------------------------------
# Layer wrappers (jitted per shape: padding/im2col glue compiled with the kernel)
# ---------------------------------------------------------------------------
@functools.partial(jax.jit, static_argnames=("out_ch", "kh", "kw", "stride", "pad"))
def conv2d(x, w, *, out_ch, kh, kw, stride, pad):
    """x: (N,H,W,Cin) bf16.  w: (round_up(Cin*kh*kw,128), round_up(out_ch,128)) bf16."""
    n, h, ww, cin = x.shape
    ho = (h + 2 * pad - kh) // stride + 1
    wo = (ww + 2 * pad - kw) // stride + 1
    if kh == 1 and kw == 1 and stride == 1 and pad == 0:
        patches = x.reshape(n * h * ww, cin)
    else:
        xp = jnp.pad(x, ((0, 0), (pad, pad), (pad, pad), (0, 0)))
        rows = []
        for dh in range(kh):
            cols = []
            for dw in range(kw):
                sl = xp[:, dh:dh + stride * (ho - 1) + 1:stride,
                        dw:dw + stride * (wo - 1) + 1:stride, :]
                cols.append(sl)                       # (N, Ho, Wo, Cin)
            rows.append(jnp.stack(cols, axis=-1))     # (N, Ho, Wo, Cin, kw)
        patches = jnp.stack(rows, axis=-2)            # (N, Ho, Wo, Cin, kh, kw)
        patches = patches.reshape(n * ho * wo, cin * kh * kw)
    m, k = patches.shape
    kp = w.shape[0]
    if kp > k:
        patches = jnp.pad(patches, ((0, 0), (0, kp - k)))
    out = _matmul(patches, w)                         # (m, Np) bf16
    return out[:, :out_ch].reshape(n, ho, wo, out_ch)


@functools.partial(jax.jit, static_argnames=("out_ch",))
def bn_relu_conv1x1(x, gamma, beta, w, *, out_ch):
    """Train-mode BN (batch stats) + ReLU fused into the following 1x1 convolution."""
    n, h, ww, c = x.shape
    m = n * h * ww
    kp = w.shape[0]                                   # round_up(c, 128)
    x2 = x.reshape(m, c)
    if kp > c:
        x2 = jnp.pad(x2, ((0, 0), (0, kp - c)))
    # per-channel batch sums (Pallas reduction kernel), then tiny per-channel math
    s, ss = pl.pallas_call(
        _bn_stats_kernel,
        out_shape=(jax.ShapeDtypeStruct((1, kp), jnp.float32),
                   jax.ShapeDtypeStruct((1, kp), jnp.float32)),
        grid_spec=pltpu.PrefetchScalarGridSpec(
            num_scalar_prefetch=0,
            grid=(kp // 128,),
            in_specs=[pl.BlockSpec((m, 128), lambda ci: (0, ci))],
            out_specs=[pl.BlockSpec((1, 128), lambda ci: (0, ci)),
                       pl.BlockSpec((1, 128), lambda ci: (0, ci))]),
        compiler_params=pltpu.CompilerParams(dimension_semantics=("parallel",)),
    )(x2)
    mean = s / m
    var = jnp.maximum(ss / m - mean * mean, 0.0)
    inv = lax.rsqrt(var + BN_EPS)
    scale = gamma * inv                               # padded channels: gamma=0 -> 0
    shift = beta - mean * scale
    out = _bn_relu_matmul(x2, scale, shift, w)        # (m, Np) bf16
    return out[:, :out_ch].reshape(n, h, ww, out_ch)


@jax.jit
def bn_relu(x, gamma, beta):
    """Standalone train-mode BatchNorm2d + ReLU, sized to the real (M, C)."""
    n, h, ww, c = x.shape
    m = n * h * ww
    cp = gamma.shape[1]
    x2 = x.reshape(m, c)
    if cp > c:
        x2 = jnp.pad(x2, ((0, 0), (0, cp - c)))
    out = pl.pallas_call(
        _bn_relu_kernel,
        out_shape=jax.ShapeDtypeStruct((m, cp), jnp.bfloat16),
        grid_spec=pltpu.PrefetchScalarGridSpec(
            num_scalar_prefetch=0,
            grid=(cp // 128,),
            in_specs=[pl.BlockSpec((m, 128), lambda ci: (0, ci)),
                      pl.BlockSpec((1, 128), lambda ci: (0, ci)),
                      pl.BlockSpec((1, 128), lambda ci: (0, ci))],
            out_specs=pl.BlockSpec((m, 128), lambda ci: (0, ci))),
        compiler_params=pltpu.CompilerParams(dimension_semantics=("parallel",)),
    )(x2, gamma, beta)
    return out[:, :c].reshape(n, h, ww, c)


@jax.jit
def maxpool_3x3_s2_p1(x):
    n, h, w, c = x.shape
    ho, wo = h // 2, w // 2
    m = n * ho * wo
    xp = jnp.pad(x, ((0, 0), (1, 1), (1, 1), (0, 0)), constant_values=-jnp.inf)
    views = [xp[:, dh:dh + 2 * (ho - 1) + 1:2, dw:dw + 2 * (wo - 1) + 1:2, :]
             .reshape(m, c) for dh in range(3) for dw in range(3)]
    stacked = jnp.stack(views, axis=0)                # (9, M, C)
    tm = 256 if m % 256 == 0 else m
    out = pl.pallas_call(
        _window_max_kernel,
        out_shape=jax.ShapeDtypeStruct((m, c), x.dtype),
        grid_spec=pltpu.PrefetchScalarGridSpec(
            num_scalar_prefetch=0,
            grid=(m // tm,),
            in_specs=[pl.BlockSpec((9, tm, c), lambda i: (0, i, 0))],
            out_specs=pl.BlockSpec((tm, c), lambda i: (i, 0))),
        compiler_params=pltpu.CompilerParams(dimension_semantics=("parallel",)),
    )(stacked)
    return out.reshape(n, ho, wo, c)


@jax.jit
def avgpool_2x2_s2(x):
    n, h, w, c = x.shape
    ho, wo = h // 2, w // 2
    m = n * ho * wo
    views = [x[:, dh::2, dw::2, :].reshape(m, c) for dh in range(2) for dw in range(2)]
    stacked = jnp.stack(views, axis=0)                # (4, M, C); C is a multiple of 128
    out = pl.pallas_call(
        _window_mean_kernel,
        out_shape=jax.ShapeDtypeStruct((m, c), x.dtype),
        grid_spec=pltpu.PrefetchScalarGridSpec(
            num_scalar_prefetch=0,
            grid=(c // 128,),
            in_specs=[pl.BlockSpec((4, m, 128), lambda ci: (0, 0, ci))],
            out_specs=pl.BlockSpec((m, 128), lambda ci: (0, ci))),
        compiler_params=pltpu.CompilerParams(dimension_semantics=("parallel",)),
    )(stacked)
    return out.reshape(n, ho, wo, c)


@jax.jit
def global_avg_pool(x):
    """adaptive_avg_pool2d((1,1)) + flatten(1) -> (N, C) float32."""
    n, h, w, c = x.shape
    stacked = x.reshape(n, h * w, c).transpose(1, 0, 2)   # (H*W, N, C)
    return pl.pallas_call(
        _window_mean_kernel,
        out_shape=jax.ShapeDtypeStruct((n, c), jnp.float32),
        grid_spec=pltpu.PrefetchScalarGridSpec(
            num_scalar_prefetch=0,
            grid=(c // 128,),
            in_specs=[pl.BlockSpec((h * w, n, 128), lambda ci: (0, 0, ci))],
            out_specs=pl.BlockSpec((n, 128), lambda ci: (0, ci))),
        compiler_params=pltpu.CompilerParams(dimension_semantics=("parallel",)),
    )(stacked)


# ---------------------------------------------------------------------------
# Deterministic synthetic parameter initialization (densenet121 shapes)
# ---------------------------------------------------------------------------
def _conv_w(key, cout, cin, kh, kw):
    fan_in = cin * kh * kw
    std = (2.0 / fan_in) ** 0.5
    w = jax.random.normal(key, (cout, cin, kh, kw), jnp.float32) * std   # PyTorch layout
    wm = w.reshape(cout, fan_in).T                                       # (K, cout)
    kp = _round_up(fan_in, 128)
    np_ = _round_up(cout, 128)
    return jnp.pad(wm, ((0, kp - fan_in), (0, np_ - cout))).astype(jnp.bfloat16)


def _bn_p(c):
    cp = _round_up(c, 128)
    gamma = jnp.pad(jnp.ones((1, c), jnp.float32), ((0, 0), (0, cp - c)))
    beta = jnp.zeros((1, cp), jnp.float32)
    return gamma, beta


def init_params(key):
    keys = iter(jax.random.split(key, 256))
    params = {'conv0': _conv_w(next(keys), NUM_INIT_FEATURES, 3, 7, 7),
              'norm0': _bn_p(NUM_INIT_FEATURES)}
    nf = NUM_INIT_FEATURES
    for bi, nlayers in enumerate(BLOCK_CONFIG):
        layers = []
        for li in range(nlayers):
            cin = nf + li * GROWTH
            layers.append({
                'norm1': _bn_p(cin),
                'conv1': _conv_w(next(keys), BN_SIZE * GROWTH, cin, 1, 1),
                'norm2': _bn_p(BN_SIZE * GROWTH),
                'conv2': _conv_w(next(keys), GROWTH, BN_SIZE * GROWTH, 3, 3),
            })
        params[f'denseblock{bi + 1}'] = layers
        nf = nf + nlayers * GROWTH
        if bi != len(BLOCK_CONFIG) - 1:
            params[f'transition{bi + 1}'] = {
                'norm': _bn_p(nf),
                'conv': _conv_w(next(keys), nf // 2, nf, 1, 1),
            }
            nf //= 2
    params['norm5'] = _bn_p(nf)     # nf == 1024
    return params


# ---------------------------------------------------------------------------
# Forward pass (mirrors DenseNetBackbone.forward)
# ---------------------------------------------------------------------------
def _dense_layer(x, p):
    out = bn_relu_conv1x1(x, p['norm1'][0], p['norm1'][1], p['conv1'],
                          out_ch=BN_SIZE * GROWTH)
    out = bn_relu(out, *p['norm2'])
    out = conv2d(out, p['conv2'], out_ch=GROWTH, kh=3, kw=3, stride=1, pad=1)
    # TODO(synk): for large inputs, replace the growing concat with a preallocated
    #             per-block channel slab; at these sizes the bf16 copy is negligible.
    return jnp.concatenate([x, out], axis=-1)


def densenet_backbone_forward(x_nchw, params):
    x = jnp.transpose(x_nchw.astype(jnp.float32), (0, 2, 3, 1)).astype(jnp.bfloat16)
    # stem: conv0 -> norm0 -> relu0 -> pool0
    x = conv2d(x, params['conv0'], out_ch=NUM_INIT_FEATURES, kh=7, kw=7, stride=2, pad=3)
    x = bn_relu(x, *params['norm0'])
    x = maxpool_3x3_s2_p1(x)
    nf = NUM_INIT_FEATURES
    for bi, nlayers in enumerate(BLOCK_CONFIG):
        for li in range(nlayers):
            x = _dense_layer(x, params[f'denseblock{bi + 1}'][li])
        nf += nlayers * GROWTH
        if bi != len(BLOCK_CONFIG) - 1:
            t = params[f'transition{bi + 1}']
            x = bn_relu_conv1x1(x, t['norm'][0], t['norm'][1], t['conv'], out_ch=nf // 2)
            x = avgpool_2x2_s2(x)
            nf //= 2
    # norm5 followed by the wrapper's F.relu (fused), then adaptive avg pool + flatten
    x = bn_relu(x, *params['norm5'])
    return global_avg_pool(x)                                     # (N, 1024) float32


# ---------------------------------------------------------------------------
if __name__ == "__main__":
    key = jax.random.PRNGKey(0)
    k_param, k_input = jax.random.split(key)
    params = init_params(k_param)
    x = jax.random.normal(k_input, (2, 3, 64, 64), jnp.float32)   # NCHW like PyTorch

    out = densenet_backbone_forward(x, params)
    out = jax.block_until_ready(out)

    assert out.shape == (2, 1024), out.shape
    assert bool(jnp.all(jnp.isfinite(out)))
    print("KERNEL_OK")
</pallas_src>

<mosaic_0001>
module attributes {stable_mosaic.version = 11 : i64} {
  func.func @_matmul_kernel(%arg0: i32, %arg1: i32, %arg2: i32, %arg3: memref<256x256xbf16, #tpu.memory_space<vmem>>, %arg4: memref<256x128xbf16, #tpu.memory_space<vmem>>, %arg5: memref<256x128xbf16, #tpu.memory_space<vmem>>, %arg6: memref<256x128xf32, #tpu.memory_space<vmem>>) attributes {dimension_semantics = [#tpu.dimension_semantics<parallel>, #tpu.dimension_semantics<parallel>, #tpu.dimension_semantics<arbitrary>], iteration_bounds = array<i64: 8, 1, 1>, scalar_prefetch = 0 : i64, scratch_operands = 1 : i64, tpu.core_type = #tpu.core_type<tc>, window_params = [{transform_indices = @transform_0, window_bounds = array<i64: 256, 256>}, {transform_indices = @transform_1, window_bounds = array<i64: 256, 128>}, {transform_indices = @transform_2, window_bounds = array<i64: 256, 128>}]} {
    %c0_i32 = arith.constant 0 : i32
    %0 = arith.cmpi eq, %arg2, %c0_i32 : i32
    %1 = arith.extui %0 : i1 to i32
    %c0_i32_0 = arith.constant 0 : i32
    %2 = arith.cmpi ne, %1, %c0_i32_0 : i32
    scf.if %2 {
      %cst_10 = arith.constant 0.000000e+00 : f32
      %12 = vector.broadcast %cst_10 : f32 to vector<256x128xf32>
      %c0_11 = arith.constant 0 : index
      %c0_12 = arith.constant 0 : index
      %13 = vector.load %arg6[%c0_11, %c0_12] : memref<256x128xf32, #tpu.memory_space<vmem>>, vector<256x128xf32>
      tpu.vector_store %arg6[%c0_11, %c0_12], %12 {strides = array<i32>} : memref<256x128xf32, #tpu.memory_space<vmem>>, vector<256x128xf32>,
    } else {
    }
    %c0 = arith.constant 0 : index
    %c0_1 = arith.constant 0 : index
    %3 = vector.load %arg6[%c0, %c0_1] : memref<256x128xf32, #tpu.memory_space<vmem>>, vector<256x128xf32>
    %c0_2 = arith.constant 0 : index
    %c0_3 = arith.constant 0 : index
    %4 = vector.load %arg3[%c0_2, %c0_3] : memref<256x256xbf16, #tpu.memory_space<vmem>>, vector<256x256xbf16>
    %c0_4 = arith.constant 0 : index
    %c0_5 = arith.constant 0 : index
    %5 = vector.load %arg4[%c0_4, %c0_5] : memref<256x128xbf16, #tpu.memory_space<vmem>>, vector<256x128xbf16>
    %cst = arith.constant dense<0.000000e+00> : vector<256x128xf32>
    %6 = tpu.matmul %4, %5, %cst {dimension_numbers = #tpu.dot_dimension_numbers<[1], [0], [0], [1], [0, 0, 1, 1], [], []>} : vector<256x256xbf16>, vector<256x128xbf16>, vector<256x128xf32> -> vector<256x128xf32>
    %7 = arith.addf %3, %6 : vector<256x128xf32>
    %c0_6 = arith.constant 0 : index
    %c0_7 = arith.constant 0 : index
    %8 = vector.load %arg6[%c0_6, %c0_7] : memref<256x128xf32, #tpu.memory_space<vmem>>, vector<256x128xf32>
    tpu.vector_store %arg6[%c0_6, %c0_7], %7 {strides = array<i32>} : memref<256x128xf32, #tpu.memory_space<vmem>>, vector<256x128xf32>,
    %c0_i32_8 = arith.constant 0 : i32
    %9 = arith.cmpi eq, %arg2, %c0_i32_8 : i32
    %10 = arith.extui %9 : i1 to i32
    %c0_i32_9 = arith.constant 0 : i32
    %11 = arith.cmpi ne, %10, %c0_i32_9 : i32
    scf.if %11 {
      %c0_10 = arith.constant 0 : index
      %c0_11 = arith.constant 0 : index
      %12 = vector.load %arg6[%c0_10, %c0_11] : memref<256x128xf32, #tpu.memory_space<vmem>>, vector<256x128xf32>
      %13 = arith.truncf %12 : vector<256x128xf32> to vector<256x128xbf16>
      %c0_12 = arith.constant 0 : index
      %c0_13 = arith.constant 0 : index
      %14 = vector.load %arg5[%c0_12, %c0_13] : memref<256x128xbf16, #tpu.memory_space<vmem>>, vector<256x128xbf16>
      tpu.vector_store %arg5[%c0_12, %c0_13], %13 {strides = array<i32>} : memref<256x128xbf16, #tpu.memory_space<vmem>>, vector<256x128xbf16>,
    } else {
    }
    return
  }
  func.func @transform_0(%arg0: i32, %arg1: i32, %arg2: i32) -> (i32, i32) {
    %c0_i32 = arith.constant 0 : i32
    return %arg0, %arg2 : i32, i32
  }
  func.func @transform_1(%arg0: i32, %arg1: i32, %arg2: i32) -> (i32, i32) {
    %c0_i32 = arith.constant 0 : i32
    return %arg2, %arg1 : i32, i32
  }
  func.func @transform_2(%arg0: i32, %arg1: i32, %arg2: i32) -> (i32, i32) {
    %c0_i32 = arith.constant 0 : i32
    return %arg0, %arg1 : i32, i32
  }
}

</mosaic_0001>

<bundles_post_ra>
// kernel: conv2d.1
= control target key start
LH: loop header
LB: loop body
LE: loop exit
PB: predicated region body
PF: predicated region fallthrough
CT: control target
= control target key end

     0   :  { %7 = vsyncpa [#allocation4], 0  ;;  %s1931_s0 = inlined_call_operand.vmem [shape: bf16[2048,256], index: 0, kind: input, shape index: {}]   ;;  %s1932_s1 = inlined_call_operand.vmem [shape: bf16[256,128], index: 1, kind: input, shape index: {}]   ;;  %s1933_s2 = inlined_call_operand.hbm [shape: bf16[2048,128], index: 2, kind: output, shape index: {}]  }
   0x1   :  { %9 = vsyncpa [#allocation4 + $0x1], 0  ;;  %s1712_s9 = smov 0   ;;  %s1714_s10 = smov 0  }
   0x2   :  { %s1716_s11 = smov 0   ;;  %s1718_s12 = smov 0  }
   0x3   :  { %s1720_s13 = smov 0   ;;  %s1722_s14 = smov 0  }
   0x4 LB: > { %s1141_s15 = sadd.s32 4294967295, %s1692_s14   ;;  %s1142_s16 = sadd.s32 4294967294, %s1692_s14   ;;  %s1692_s14 = sphi %s1722_s14, %s15_s14   ;;  %s1688_s13 = sphi %s1720_s13, %s1940_s13   ;;  %s1684_s12 = sphi %s1718_s12, %s1939_s12   ;;  %s1680_s11 = sphi %s1716_s11, %s1938_s11   ;;  %s1676_s10 = sphi %s1714_s10, %s1937_s10   ;;  %s1672_s9 = sphi %s1712_s9, %s1936_s9  }
   0x5   : > { %s34_s17 = sadd.s32 1, %s1688_s13  ;;  %s99_s18 = sadd.s32 1, %s1680_s11 }
   0x6   : > { %p36_p0 = scmp.ge.s32.totalorder %s34_s17, 8  ;;  %p109_p1 = scmp.ne.s32.totalorder %s1680_s11, %s1676_s10 }
   0x7   : > { %p110_p2 = scmp.eq.s32.totalorder %s1141_s15, 7  ;;  %p115_p3 = scmp.ne.s32.totalorder %s1676_s10, %s1672_s9 }
   0x8   : > { %s1942_s17 = smov (%p36_p0, %s34_s17), 0  ;;  %p116_p5 = scmp.eq.s32.totalorder %s1142_s16, 7 }
   0x9   : > { %p1752_p4 = por %p110_p2, %p109_p1  ;;  %s94_s20 = ssub.s32 %s1688_s13, %s1942_s17 }
   0xa   : > { %p1146_p6 = scmp.ge.s32.totalorder %s1692_s14, 1  ;;  %p97_p7 = scmp.eq.s32.totalorder %s94_s20, 0 }
   0xb   : > { %p1759_p8 = por %p116_p5, %p115_p3  ;;  %p161_p9 = scmp.lt.s32.totalorder %s1692_s14, 9 }
   0xc   : > { %s1765_s22 = scalar_select %p97_p7, %s1680_s11, %s99_s18  }
   0xd   : > { %p162_p10 = pnand %p1146_p6, %p161_p9 }
   0xe   : > { %v1550_v0 = vld [vmem:[%s1932_s1 + $0x40] sm:$0xff] (!%p162_p10)   ;;  %s1148_s25 = sshll.u32 (!%p162_p10), %s1684_s12, 5  ;;  %v1552_v2 = vld [vmem:[%s1932_s1 + $0x48] sm:$0xff] (!%p162_p10)   ;;  %v1554_v4 = vld [vmem:[%s1932_s1 + $0x50] sm:$0xff] (!%p162_p10)   ;;  %s193_s24 = sand.u32 (!%p162_p10), 1, %s1676_s10  }
   0xf   : > { %165 = sbr.rel (%p162_p10) target bundleno = 337 (0x151), region = 28  ;;  %v1551_v1 = vld [vmem:[%s1932_s1] sm:$0xff] (!%p162_p10)   ;;  %1365 = vmatprep.subr.bf16.mxu0 (!%p162_p10), %v1550_v0  ;;  %1477 = vmatprep.subr.bf16.mxu1 (!%p162_p10), %v1550_v0  ;;  %v1553_v3 = vld [vmem:[%s1932_s1 + $0x8] sm:$0xff] (!%p162_p10)   ;;  %p198_p11 = scmp.lt.s32.totalorder (!%p162_p10), %s1148_s25, 255  ;;  %v1555_v5 = vld [vmem:[%s1932_s1 + $0x10] sm:$0xff] (!%p162_p10)  }
  0x10   : > { %1366 = vmatpush3.bf16.msra.mxu0 (!%p162_p10), %v1551_v1  ;;  %1485 = vmatpush3.bf16.msra.mxu1 (!%p162_p10), %v1551_v1  ;;  %v1556_v6 = vld [vmem:[%s1932_s1 + $0x58] sm:$0xff] (!%p162_p10)   ;;  %v1558_v8 = vld [vmem:[%s1932_s1 + $0x60] sm:$0xff] (!%p162_p10)   ;;  %v1560_v10 = vld [vmem:[%s1932_s1 + $0x68] sm:$0xff] (!%p162_p10)   ;;  %s1147_s26 = sshll.u32 (!%p162_p10), %s193_s24, 7  ;;  %s1694_s5 = smov (!%p162_p10), [#allocation3]  }
  0x11   : > { %1367 = vmatprep.subr.bf16.mxu0 (!%p162_p10), %v1552_v2  ;;  %1478 = vmatprep.subr.bf16.mxu1 (!%p162_p10), %v1552_v2  ;;  %v1557_v7 = vld [vmem:[%s1932_s1 + $0x18] sm:$0xff] (!%p162_p10)   ;;  %v1559_v9 = vld [vmem:[%s1932_s1 + $0x20] sm:$0xff] (!%p162_p10)   ;;  %v1561_v13 = vld [vmem:[%s1932_s1 + $0x28] sm:$0xff] (!%p162_p10)   ;;  %s1856_s27 = scalar_lea.vmem (!%p162_p10), [#allocation3], %s1147_s26  ;;  %s1618_s6 = sshll.u32 (!%p162_p10), %s1694_s5, 4  ;;  %s1619_s6 = int_to_ptr.vmem [resolvable:$false] %s1618_s6 }
  0x12   : > { %v1562_v14 = vld [vmem:[%s1932_s1 + $0x70] sm:$0xff] (!%p162_p10)   ;;  %v1564_v16 = vld [vmem:[%s1932_s1 + $0x78] sm:$0xff] (!%p162_p10)   ;;  %s1042_s29 = sshll.u32 (!%p162_p10), %s1856_s27, 4  ;;  %s1620_s7 = scalar_lea.vmem (!%p162_p10), %s1619_s6, 4096  ;;  %s1879_s29 = int_to_ptr.vmem [resolvable:$true] %s1042_s29 }
  0x13   : > { %v1563_v15 = vld [vmem:[%s1932_s1 + $0x30] sm:$0xff] (!%p162_p10)   ;;  %v1565_v17 = vld [vmem:[%s1932_s1 + $0x38] sm:$0xff] (!%p162_p10)   ;;  %s1614_s4 = scalar_lea.vmem (!%p162_p10), %s1879_s29, 2048  ;;  %p1621_p1 = scmp.lt.s32.totalorder (!%p162_p10), %s1879_s29, %s1619_s6 }
  0x14   : > { %1368 = vmatpush3.bf16.msra.mxu0 (!%p162_p10), %v1553_v3  ;;  %1486 = vmatpush3.bf16.msra.mxu1 (!%p162_p10), %v1553_v3  ;;  %p1615_p12 = scmp.ne.s32.totalorder (!%p162_p10), %s1879_s29, %s1614_s4  ;;  %p1622_p2 = scmp.lt.s32.totalorder (!%p162_p10), %s1620_s7, %s1614_s4 }
  0x15   : > { %1369 = vmatprep.subr.bf16.mxu0 (!%p162_p10), %v1554_v4  ;;  %1479 = vmatprep.subr.bf16.mxu1 (!%p162_p10), %v1554_v4 }
  0x16   : > { %s1944_s25 = smov (!%p198_p11, %s1148_s25), 255  ;;  %p1616_p13 = pnand %p1615_p12, %p1752_p4 }
  0x17   : > { %s1236_s20 = sshll.u32 %s1944_s25, 3  ;;  %p1623_p3 = por %p1622_p2, %p1621_p1 }
  0x18   : > { %1370 = vmatpush3.bf16.msra.mxu0 %v1555_v5  ;;  %1487 = vmatpush3.bf16.msra.mxu1 %v1555_v5  ;;  %s1798_s28 = scalar_lea.vmem %s1931_s0, %s1236_s20  ;;  %p1617_p0 = pneg %p1616_p13 }
  0x19   : > { %1371 = vmatprep.subr.bf16.mxu0 %v1556_v6  ;;  %1480 = vmatprep.subr.bf16.mxu1 %v1556_v6  ;;  %v1568_v11 = vld [vmem:[%s1798_s28 + $0x4] ss:$8 sps:$4 sm:$0xff]   ;;  %v1566_v18 = vld [vmem:[%s1798_s28] ss:$8 sps:$4 sm:$0xff]   ;;  %v1572_v20 = vld [vmem:[%s1798_s28 + $0x14] ss:$8 sps:$4 sm:$0xff]  }
  0x1a   : > { %v1571_v12 = vld [vmem:[%s1798_s28 + $0x84] ss:$8 sps:$4 sm:$0xff]   ;;  %639 = vmatprep.mubr.bf16.mxu0 %v1568_v11  ;;  %v1569_v19 = vld [vmem:[%s1798_s28 + $0x80] ss:$8 sps:$4 sm:$0xff]   ;;  %v1574_v21 = vld [vmem:[%s1798_s28 + $0x94] ss:$8 sps:$4 sm:$0xff]   ;;  %p1624_p5 = pnand %p1623_p3, %p1617_p0 }
  0x1b   : > { %703 = vmatprep.mubr.bf16.mxu1 %v1571_v12  ;;  %v1576_v22 = vld [vmem:[%s1798_s28 + $0x10] ss:$8 sps:$4 sm:$0xff]   ;;  %v1578_v24 = vld [vmem:[%s1798_s28 + $0x24] ss:$8 sps:$4 sm:$0xff]   ;;  %v1582_v26 = vld [vmem:[%s1798_s28 + $0x20] ss:$8 sps:$4 sm:$0xff]  }
  0x1c   : > { %1372 = vmatpush3.bf16.msra.mxu0 %v1557_v7  ;;  %1488 = vmatpush3.bf16.msra.mxu1 %v1557_v7  ;;  %v1577_v23 = vld [vmem:[%s1798_s28 + $0x90] ss:$8 sps:$4 sm:$0xff]   ;;  %v1580_v25 = vld [vmem:[%s1798_s28 + $0xa4] ss:$8 sps:$4 sm:$0xff]   ;;  %v1583_v27 = vld [vmem:[%s1798_s28 + $0xa0] ss:$8 sps:$4 sm:$0xff]  }
  0x1d   : > { %1373 = vmatprep.subr.bf16.mxu0 %v1558_v8  ;;  %1481 = vmatprep.subr.bf16.mxu1 %v1558_v8  ;;  %v1584_v28 = vld [vmem:[%s1798_s28 + $0x34] ss:$8 sps:$4 sm:$0xff]   ;;  %v1588_v30 = vld [vmem:[%s1798_s28 + $0x30] ss:$8 sps:$4 sm:$0xff]   ;;  %v1590_v32 = vld [vmem:[%s1798_s28 + $0x44] ss:$8 sps:$4 sm:$0xff]  }
  0x1e   : > { %v1586_v29 = vld [vmem:[%s1798_s28 + $0xb4] ss:$8 sps:$4 sm:$0xff]   ;;  %v1589_v31 = vld [vmem:[%s1798_s28 + $0xb0] ss:$8 sps:$4 sm:$0xff]   ;;  %v1592_v33 = vld [vmem:[%s1798_s28 + $0xc4] ss:$8 sps:$4 sm:$0xff]  }
  0x1f   : > { %v1594_v34 = vld [vmem:[%s1798_s28 + $0x40] ss:$8 sps:$4 sm:$0xff]   ;;  %v1596_v36 = vld [vmem:[%s1798_s28 + $0x54] ss:$8 sps:$4 sm:$0xff]   ;;  %v1600_v38 = vld [vmem:[%s1798_s28 + $0x50] ss:$8 sps:$4 sm:$0xff]  }
  0x20   : > { %1374 = vmatpush3.bf16.msra.mxu0 %v1559_v9  ;;  %1489 = vmatpush3.bf16.msra.mxu1 %v1559_v9  ;;  %v1595_v35 = vld [vmem:[%s1798_s28 + $0xc0] ss:$8 sps:$4 sm:$0xff]   ;;  %v1598_v37 = vld [vmem:[%s1798_s28 + $0xd4] ss:$8 sps:$4 sm:$0xff]   ;;  %v1601_v39 = vld [vmem:[%s1798_s28 + $0xd0] ss:$8 sps:$4 sm:$0xff]  }
  0x21   : > { %1375 = vmatprep.subr.bf16.mxu0 %v1560_v10  ;;  %1482 = vmatprep.subr.bf16.mxu1 %v1560_v10  ;;  %v1602_v40 = vld [vmem:[%s1798_s28 + $0x64] ss:$8 sps:$4 sm:$0xff]   ;;  %v1606_v42 = vld [vmem:[%s1798_s28 + $0x60] ss:$8 sps:$4 sm:$0xff]   ;;  %v1608_v44 = vld [vmem:[%s1798_s28 + $0x74] ss:$8 sps:$4 sm:$0xff]  }
  0x22   : > { %v1604_v41 = vld [vmem:[%s1798_s28 + $0xe4] ss:$8 sps:$4 sm:$0xff]   ;;  %v1607_v43 = vld [vmem:[%s1798_s28 + $0xe0] ss:$8 sps:$4 sm:$0xff]   ;;  %v1610_v45 = vld [vmem:[%s1798_s28 + $0xf4] ss:$8 sps:$4 sm:$0xff]  }
  0x23   : > { %v1612_v46 = vld [vmem:[%s1798_s28 + $0x70] ss:$8 sps:$4 sm:$0xff]  }
  0x24   : > { %1376 = vmatpush3.bf16.msra.mxu0 %v1561_v13  ;;  %1490 = vmatpush3.bf16.msra.mxu1 %v1561_v13  ;;  %v1613_v47 = vld [vmem:[%s1798_s28 + $0xf0] ss:$8 sps:$4 sm:$0xff]   ;;  %s1269_s28 = sshll.u32 %s1684_s12, 11  ;;  %s1885_s12 = scalar_lea.sflag [#allocation4], %s193_s24 }
  0x25   : > { %1377 = vmatprep.subr.bf16.mxu0 %v1562_v14  ;;  %1483 = vmatprep.subr.bf16.mxu1 %v1562_v14  ;;  %s1877_s3 = scalar_lea.hbm %s1933_s2, %s1269_s28 }
  0x28   : > { %1378 = vmatpush3.bf16.msra.mxu0 %v1563_v15  ;;  %1491 = vmatpush3.bf16.msra.mxu1 %v1563_v15 }
  0x29   : > { %1379 = vmatprep.subr.bf16.mxu0 %v1564_v16  ;;  %1484 = vmatprep.subr.bf16.mxu1 %v1564_v16 }
  0x2c   : > { %1380 = vmatpush3.bf16.msra.mxu0 %v1565_v17  ;;  %1492 = vmatpush3.bf16.msra.mxu1 %v1565_v17 }
  0x2f   : > { %640 = vmatmul.mubr.bf16.vlgmr.msra.gmra.mrb[0].mxu0 %v1566_v18  ;;  %704 = vmatmul.mubr.bf16.vlgmr.msra.gmra.mrb[0].mxu1 %v1569_v19 }
  0x30   : > { %647 = vmatprep.mubr.bf16.mxu0 %v1572_v20  ;;  %711 = vmatprep.mubr.bf16.mxu1 %v1574_v21 }
  0x37   : > { %648 = vmatmul.mubr.bf16.gmra.mrb[4].mxu0 %v1576_v22  ;;  %712 = vmatmul.mubr.bf16.gmra.mrb[4].mxu1 %v1577_v23 }
  0x38   : > { %655 = vmatprep.mubr.bf16.mxu0 %v1578_v24  ;;  %719 = vmatprep.mubr.bf16.mxu1 %v1580_v25 }
  0x3f   : > { %656 = vmatmul.mubr.bf16.gmra.mrb[8].mxu0 %v1582_v26  ;;  %720 = vmatmul.mubr.bf16.gmra.mrb[8].mxu1 %v1583_v27 }
  0x40   : > { %663 = vmatprep.mubr.bf16.mxu0 %v1584_v28  ;;  %727 = vmatprep.mubr.bf16.mxu1 %v1586_v29 }
  0x47   : > { %664 = vmatmul.mubr.bf16.gmra.mrb[12].mxu0 %v1588_v30  ;;  %728 = vmatmul.mubr.bf16.gmra.mrb[12].mxu1 %v1589_v31 }
  0x48   : > { %671 = vmatprep.mubr.bf16.mxu0 %v1590_v32  ;;  %735 = vmatprep.mubr.bf16.mxu1 %v1592_v33 }
  0x4f   : > { %672 = vmatmul.mubr.bf16.gmra.mrb[16].mxu0 %v1594_v34  ;;  %736 = vmatmul.mubr.bf16.gmra.mrb[16].mxu1 %v1595_v35 }
  0x50   : > { %679 = vmatprep.mubr.bf16.mxu0 %v1596_v36  ;;  %743 = vmatprep.mubr.bf16.mxu1 %v1598_v37 }
  0x57   : > { %680 = vmatmul.mubr.bf16.gmra.mrb[20].mxu0 %v1600_v38  ;;  %744 = vmatmul.mubr.bf16.gmra.mrb[20].mxu1 %v1601_v39 }
  0x58   : > { %687 = vmatprep.mubr.bf16.mxu0 %v1602_v40  ;;  %751 = vmatprep.mubr.bf16.mxu1 %v1604_v41 }
  0x5f   : > { %688 = vmatmul.mubr.bf16.gmra.mrb[24].mxu0 %v1606_v42  ;;  %752 = vmatmul.mubr.bf16.gmra.mrb[24].mxu1 %v1607_v43 }
  0x60   : > { %695 = vmatprep.mubr.bf16.mxu0 %v1608_v44  ;;  %759 = vmatprep.mubr.bf16.mxu1 %v1610_v45 }
  0x67   : > { %696 = vmatmul.mubr.bf16.gmra.mrb[28].mxu0 %v1612_v46  ;;  %760 = vmatmul.mubr.bf16.gmra.mrb[28].mxu1 %v1613_v47 }
 0x102   : > { %v1381_v48 = vpop.f32.mrb[0].mxu0  ;;  %v1429_v49 = vpop.f32.mrb[0].mxu1 }
 0x103   : > { %v1382_v50 = vpop.f32.mrb[1].mxu0  ;;  %v1430_v51 = vpop.f32.mrb[1].mxu1 }
 0x104   : > { %v1383_v52 = vadd.f32 %v1382_v50, %v1381_v48  ;;  %v1431_v53 = vadd.f32 %v1430_v51, %v1429_v49  ;;  %v1384_v54 = vpop.f32.mrb[2].mxu0  ;;  %v1432_v55 = vpop.f32.mrb[2].mxu1 }
 0x105   : > { %v1385_v56 = vpop.f32.mrb[3].mxu0  ;;  %v1433_v57 = vpop.f32.mrb[3].mxu1 }
 0x106   : > { %v1386_v58 = vadd.f32 %v1385_v56, %v1384_v54  ;;  %v1434_v59 = vadd.f32 %v1433_v57, %v1432_v55 }
 0x108   : > { %v1273_v60 = vpack.c.bf16 %v1386_v58, %v1383_v52  ;;  %v1313_v61 = vpack.c.bf16 %v1434_v59, %v1431_v53 }
 0x10a   : > { %1274 = vst [vmem:[%s1856_s27] sm:$0xff] %v1273_v60   ;;  %1357 = vst [vmem:[%s1856_s27 + $0x40] sm:$0xff] %v1313_v61   ;;  %v1387_v62 = vpop.f32.mrb[4].mxu0  ;;  %v1435_v63 = vpop.f32.mrb[4].mxu1 }
 0x10b   : > { %v1388_v0 = vpop.f32.mrb[5].mxu0  ;;  %v1436_v1 = vpop.f32.mrb[5].mxu1 }
 0x10c   : > { %v1389_v2 = vadd.f32 %v1388_v0, %v1387_v62  ;;  %v1437_v3 = vadd.f32 %v1436_v1, %v1435_v63  ;;  %v1390_v4 = vpop.f32.mrb[6].mxu0  ;;  %v1438_v5 = vpop.f32.mrb[6].mxu1 }
 0x10d   : > { %v1391_v6 = vpop.f32.mrb[7].mxu0  ;;  %v1439_v7 = vpop.f32.mrb[7].mxu1 }
 0x10e   : > { %v1392_v8 = vadd.f32 %v1391_v6, %v1390_v4  ;;  %v1440_v9 = vadd.f32 %v1439_v7, %v1438_v5 }
 0x110   : > { %v1278_v10 = vpack.c.bf16 %v1392_v8, %v1389_v2  ;;  %v1318_v11 = vpack.c.bf16 %v1440_v9, %v1437_v3 }
 0x112   : > { %1350 = vst [vmem:[%s1856_s27 + $0x8] sm:$0xff] %v1278_v10   ;;  %1358 = vst [vmem:[%s1856_s27 + $0x48] sm:$0xff] %v1318_v11   ;;  %v1393_v12 = vpop.f32.mrb[8].mxu0  ;;  %v1441_v13 = vpop.f32.mrb[8].mxu1 }
 0x113   : > { %v1394_v14 = vpop.f32.mrb[9].mxu0  ;;  %v1442_v15 = vpop.f32.mrb[9].mxu1 }
 0x114   : > { %v1395_v16 = vadd.f32 %v1394_v14, %v1393_v12  ;;  %v1443_v17 = vadd.f32 %v1442_v15, %v1441_v13  ;;  %v1396_v18 = vpop.f32.mrb[10].mxu0  ;;  %v1444_v19 = vpop.f32.mrb[10].mxu1 }
 0x115   : > { %v1397_v20 = vpop.f32.mrb[11].mxu0  ;;  %v1445_v21 = vpop.f32.mrb[11].mxu1 }
 0x116   : > { %v1398_v22 = vadd.f32 %v1397_v20, %v1396_v18  ;;  %v1446_v23 = vadd.f32 %v1445_v21, %v1444_v19 }
 0x118   : > { %v1283_v24 = vpack.c.bf16 %v1398_v22, %v1395_v16  ;;  %v1323_v25 = vpack.c.bf16 %v1446_v23, %v1443_v17 }
 0x11a   : > { %1351 = vst [vmem:[%s1856_s27 + $0x10] sm:$0xff] %v1283_v24   ;;  %1359 = vst [vmem:[%s1856_s27 + $0x50] sm:$0xff] %v1323_v25   ;;  %v1399_v26 = vpop.f32.mrb[12].mxu0  ;;  %v1447_v27 = vpop.f32.mrb[12].mxu1 }
 0x11b   : > { %v1400_v28 = vpop.f32.mrb[13].mxu0  ;;  %v1448_v29 = vpop.f32.mrb[13].mxu1 }
 0x11c   : > { %v1401_v30 = vadd.f32 %v1400_v28, %v1399_v26  ;;  %v1449_v31 = vadd.f32 %v1448_v29, %v1447_v27  ;;  %v1402_v32 = vpop.f32.mrb[14].mxu0  ;;  %v1450_v33 = vpop.f32.mrb[14].mxu1 }
 0x11d   : > { %v1403_v34 = vpop.f32.mrb[15].mxu0  ;;  %v1451_v35 = vpop.f32.mrb[15].mxu1 }
 0x11e   : > { %v1404_v36 = vadd.f32 %v1403_v34, %v1402_v32  ;;  %v1452_v37 = vadd.f32 %v1451_v35, %v1450_v33 }
 0x120   : > { %v1288_v38 = vpack.c.bf16 %v1404_v36, %v1401_v30  ;;  %v1328_v39 = vpack.c.bf16 %v1452_v37, %v1449_v31 }
 0x122   : > { %1352 = vst [vmem:[%s1856_s27 + $0x18] sm:$0xff] %v1288_v38   ;;  %1360 = vst [vmem:[%s1856_s27 + $0x58] sm:$0xff] %v1328_v39   ;;  %v1405_v40 = vpop.f32.mrb[16].mxu0  ;;  %v1453_v41 = vpop.f32.mrb[16].mxu1 }
 0x123   : > { %v1406_v42 = vpop.f32.mrb[17].mxu0  ;;  %v1454_v43 = vpop.f32.mrb[17].mxu1 }
 0x124   : > { %v1407_v44 = vadd.f32 %v1406_v42, %v1405_v40  ;;  %v1455_v45 = vadd.f32 %v1454_v43, %v1453_v41  ;;  %v1408_v46 = vpop.f32.mrb[18].mxu0  ;;  %v1456_v47 = vpop.f32.mrb[18].mxu1 }
 0x125   : > { %v1409_v48 = vpop.f32.mrb[19].mxu0  ;;  %v1457_v49 = vpop.f32.mrb[19].mxu1 }
 0x126   : > { %v1410_v50 = vadd.f32 %v1409_v48, %v1408_v46  ;;  %v1458_v51 = vadd.f32 %v1457_v49, %v1456_v47 }
 0x128   : > { %v1293_v52 = vpack.c.bf16 %v1410_v50, %v1407_v44  ;;  %v1333_v53 = vpack.c.bf16 %v1458_v51, %v1455_v45 }
 0x12a   : > { %1353 = vst [vmem:[%s1856_s27 + $0x20] sm:$0xff] %v1293_v52   ;;  %1361 = vst [vmem:[%s1856_s27 + $0x60] sm:$0xff] %v1333_v53   ;;  %v1411_v54 = vpop.f32.mrb[20].mxu0  ;;  %v1459_v55 = vpop.f32.mrb[20].mxu1 }
 0x12b   : > { %v1412_v56 = vpop.f32.mrb[21].mxu0  ;;  %v1460_v57 = vpop.f32.mrb[21].mxu1 }
 0x12c   : > { %v1413_v58 = vadd.f32 %v1412_v56, %v1411_v54  ;;  %v1461_v59 = vadd.f32 %v1460_v57, %v1459_v55  ;;  %v1414_v60 = vpop.f32.mrb[22].mxu0  ;;  %v1462_v61 = vpop.f32.mrb[22].mxu1 }
 0x12d   : > { %v1415_v62 = vpop.f32.mrb[23].mxu0  ;;  %v1463_v63 = vpop.f32.mrb[23].mxu1 }
 0x12e   : > { %v1416_v0 = vadd.f32 %v1415_v62, %v1414_v60  ;;  %v1464_v1 = vadd.f32 %v1463_v63, %v1462_v61 }
 0x130   : > { %v1298_v2 = vpack.c.bf16 %v1416_v0, %v1413_v58  ;;  %v1338_v3 = vpack.c.bf16 %v1464_v1, %v1461_v59 }
 0x132   : > { %1354 = vst [vmem:[%s1856_s27 + $0x28] sm:$0xff] %v1298_v2   ;;  %1362 = vst [vmem:[%s1856_s27 + $0x68] sm:$0xff] %v1338_v3   ;;  %v1417_v4 = vpop.f32.mrb[24].mxu0  ;;  %v1465_v5 = vpop.f32.mrb[24].mxu1 }
 0x133   : > { %v1418_v6 = vpop.f32.mrb[25].mxu0  ;;  %v1466_v7 = vpop.f32.mrb[25].mxu1 }
 0x134   : > { %v1419_v8 = vadd.f32 %v1418_v6, %v1417_v4  ;;  %v1467_v9 = vadd.f32 %v1466_v7, %v1465_v5  ;;  %v1420_v10 = vpop.f32.mrb[26].mxu0  ;;  %v1468_v11 = vpop.f32.mrb[26].mxu1 }
 0x135   : > { %v1421_v12 = vpop.f32.mrb[27].mxu0  ;;  %v1469_v13 = vpop.f32.mrb[27].mxu1 }
 0x136   : > { %v1422_v14 = vadd.f32 %v1421_v12, %v1420_v10  ;;  %v1470_v15 = vadd.f32 %v1469_v13, %v1468_v11 }
 0x138   : > { %v1303_v16 = vpack.c.bf16 %v1422_v14, %v1419_v8  ;;  %v1343_v17 = vpack.c.bf16 %v1470_v15, %v1467_v9 }
 0x13a   : > { %1355 = vst [vmem:[%s1856_s27 + $0x30] sm:$0xff] %v1303_v16   ;;  %1363 = vst [vmem:[%s1856_s27 + $0x70] sm:$0xff] %v1343_v17   ;;  %v1423_v18 = vpop.f32.mrb[28].mxu0  ;;  %v1471_v19 = vpop.f32.mrb[28].mxu1 }
 0x13b   : > { %v1424_v20 = vpop.f32.mrb[29].mxu0  ;;  %v1472_v21 = vpop.f32.mrb[29].mxu1 }
 0x13c   : > { %v1425_v22 = vadd.f32 %v1424_v20, %v1423_v18  ;;  %v1473_v23 = vadd.f32 %v1472_v21, %v1471_v19  ;;  %v1426_v24 = vpop.f32.mrb[30].mxu0  ;;  %v1474_v25 = vpop.f32.mrb[30].mxu1 }
 0x13d   : > { %v1427_v26 = vpop.f32.mrb[31].mxu0  ;;  %v1475_v27 = vpop.f32.mrb[31].mxu1 }
 0x13e   : > { %v1428_v28 = vadd.f32 %v1427_v26, %v1426_v24  ;;  %v1476_v29 = vadd.f32 %v1475_v27, %v1474_v25 }
 0x140   : > { %v1308_v30 = vpack.c.bf16 %v1428_v28, %v1425_v22  ;;  %v1348_v31 = vpack.c.bf16 %v1476_v29, %v1473_v23 }
 0x142   : > { %1356 = vst [vmem:[%s1856_s27 + $0x38] sm:$0xff] %v1308_v30   ;;  %1364 = vst [vmem:[%s1856_s27 + $0x78] sm:$0xff] %v1348_v31  }
 0x143   : > { %1627 = shalt.err (!%p1624_p5)
}
 0x144   : > { %s1628_s8 = scalar_lea.hbm %s1877_s3, 2048  ;;  %s1632_s18 = scalar_lea.hbm %s1933_s2, 16384 }
 0x145   : > { %p1629_p6 = scmp.ne.s32.totalorder %s1877_s3, %s1628_s8  ;;  %p1633_p10 = scmp.lt.u32.totalorder %s1877_s3, %s1933_s2 }
 0x146   : > { %p1634_p11 = scmp.lt.u32.totalorder %s1632_s18, %s1628_s8  ;;  %p1636_p13 = scmp.lt.u32.totalorder %s1628_s8, %s1877_s3 }
 0x147   : > { %p1630_p7 = pnand %p1629_p6, %p1752_p4 }
 0x148   : > { %p1635_p12 = por %p1634_p11, %p1633_p10 }
 0x149   : > { %p1631_p9 = pneg %p1630_p7 }
 0x14a   : > { %p1637_p0 = por %p1636_p13, %p1635_p12 }
 0x14c   : > { %p1638_p1 = pnand %p1637_p0, %p1631_p9 }
 0x14e   : > { %1641 = shalt.err (!%p1638_p1)
}
 0x14f   : > { %s1695_s24 = smov 64   ;;  %s1696_s26 = smov 4  }
 0x150   : > { %1493 = dma.vmem_to_hbm [thread:$0]  (%p1752_p4), %s1879_s29, 2048, %s1877_s3, %s1885_s12, %s1695_s24, %s1695_s24, %s1696_s26  }
 0x151 PF: > { %p1499_p2 = scmp.ge.s32.totalorder %s1692_s14, 2  ;;  %s1057_s27 = sand.u32 1, %s1672_s9  }
 0x152   : > { %s1058_s28 = scalar_lea.sflag [#allocation4], %s1057_s27 }
 0x153   : > { %p1496_p3 = pnand %p1499_p2, %p1759_p8 }
 0x155   : > { %1667 = dma.done.wait (!%p1496_p3), %s1058_s28, 2048  }
 0x156   : > { %1669 = vsyncadd (!%p1496_p3), %s1058_s28, 4294965248  ;;  %s15_s14 = sadd.s32 1, %s1692_s14   ;;  %s1936_s9 = smov %s1676_s10 }
 0x157   : > { %p12_p5 = scmp.ge.s32.totalorder %s15_s14, 10   ;;  %s1937_s10 = smov %s1680_s11 }
 0x158   : > { %s1938_s11 = smov %s1765_s22  ;;  %s1939_s12 = smov %s1688_s13 }
 0x159   : > { %s1940_s13 = smov %s1942_s17  ;;  %14 = sbr.rel (!%p12_p5) target bundleno = 4 (0x4), region = 74 }
 0x160   :  { %1063 = vsyncpa [#allocation4], 1 }
 0x161   :  { %1065 = vsyncpa [#allocation4 + $0x1], 1 }

</bundles_post_ra>
